<compile_context>
chip_gen: v7x
topology: tpu7x:2x2x1
jax: 0.10.0
libtpu: 0.0.40
codegen_flags: <defaults>
</compile_context>

<pallas_src>
import functools

import jax
import jax.numpy as jnp
from jax.experimental import pallas as pl
from jax.experimental.pallas import tpu as pltpu

HIDDEN_DIM = 32
OUTPUT_DIM = 4
TRUNK_W = 128          # 3 * HIDDEN_DIM = 96 padded to a full 128-lane vreg
ABC_W = 128            # 2*D*D + D = 36 padded to 128 (MXU pass is 128 lanes anyway)
OUT_W = 8              # narrow output: D=4 live lanes padded to 8
MAX_TILE = 8192        # rows per grid step (fits v7x's 64 MiB VMEM comfortably)


def _round_up(x, m):
    return ((x + m - 1) // m) * m


def _gaussian_net_kernel(slab_ref, w1_ref, b1_ref, w2_ref, b2_ref,
                         w3_ref, b3_ref, w4_ref, b4_ref, rep_ref, sum_ref,
                         out_ref, *, d):
    slab = slab_ref[...]                                           # (TN, SLAB_W) f32
    t_col = slab[:, 2 * d:2 * d + 1]                               # (TN, 1) f32

    # Layer 1 (fan_in = 1): VPU broadcast-FMA instead of a K=16 MXU matmul.
    h = jnp.maximum(t_col * w1_ref[...] + b1_ref[...], 0.0)        # (TN, 128) f32
    h = h.astype(jnp.bfloat16)

    # Layers 2..4: bf16 MXU matmuls over block-diagonal slabs, f32 accumulation.
    h = jnp.maximum(
        jnp.dot(h, w2_ref[...], preferred_element_type=jnp.float32)
        + b2_ref[...], 0.0).astype(jnp.bfloat16)
    h = jnp.maximum(
        jnp.dot(h, w3_ref[...], preferred_element_type=jnp.float32)
        + b3_ref[...], 0.0).astype(jnp.bfloat16)
    abc = jnp.dot(h, w4_ref[...], preferred_element_type=jnp.float32) \
        + b4_ref[...]                                              # (TN, 128) f32

    dd = d * d
    a_flat = abc[:, 0:dd]                                          # (TN, D*D)
    b_flat = abc[:, dd:2 * dd]                                     # (TN, D*D)
    c_vec = abc[:, 2 * dd:2 * dd + d]                              # (TN, D)

    theta = slab[:, 0:d]                                           # (TN, D) f32
    x = slab[:, d:2 * d]                                           # (TN, D) f32

    rep = rep_ref[...]                                             # (D, D*D) 0/1
    summ = sum_ref[...]                                            # (D*D, OUT_W) 0/1

    # Bx[n, i] = sum_j B[n, i*D + j] * x[n, j]:
    #   replicate x via constant matmul, tile-multiply, block-sum matmul.
    x_rep = jnp.dot(x, rep, preferred_element_type=jnp.float32)    # (TN, D*D)
    bx = jnp.dot(b_flat * x_rep, summ,
                 preferred_element_type=jnp.float32)[:, :d]        # (TN, D)

    v = theta + bx + c_vec                                         # (TN, D)
    v_rep = jnp.dot(v, rep, preferred_element_type=jnp.float32)    # (TN, D*D)

    # Narrow output: score in lanes [0:D], zeros in [D:OUT_W].
    out_ref[...] = jnp.dot(a_flat * v_rep, summ,
                           preferred_element_type=jnp.float32)     # (TN, OUT_W)


def init_params(key, hidden_dim, output_dim):
    """Deterministic synthetic parameters (PyTorch-Linear-style uniform init)."""
    H, D = hidden_dim, output_dim

    def lin(k, fan_in, fan_out):
        kw, kb = jax.random.split(k)
        bound = 1.0 / jnp.sqrt(jnp.float32(fan_in))
        w = jax.random.uniform(kw, (fan_in, fan_out), jnp.float32, -bound, bound)
        b = jax.random.uniform(kb, (1, fan_out), jnp.float32, -bound, bound)
        return w, b

    keys = iter(jax.random.split(key, 16))
    w1s, b1s, w2s, b2s, w3s, b3s = [], [], [], [], [], []
    for _ in range(3):  # trunks of A_t, B_t, C_t
        w1, b1 = lin(next(keys), 1, H)
        w2, b2 = lin(next(keys), H, H)
        w3, b3 = lin(next(keys), H, H)
        w1s.append(w1); b1s.append(b1)
        w2s.append(w2); b2s.append(b2)
        w3s.append(w3); b3s.append(b3)

    wa4, ba4 = lin(next(keys), H, D * D)
    wb4, bb4 = lin(next(keys), H, D * D)
    wc4, bc4 = lin(next(keys), H, D)

    return dict(
        w1=jnp.stack(w1s), b1=jnp.stack(b1s),   # (3, 1, H), (3, 1, H)
        w2=jnp.stack(w2s), b2=jnp.stack(b2s),   # (3, H, H), (3, 1, H)
        w3=jnp.stack(w3s), b3=jnp.stack(b3s),   # (3, H, H), (3, 1, H)
        wa4=wa4, ba4=ba4, wb4=wb4, bb4=bb4, wc4=wc4, bc4=bc4,
    )


def pack_params(params, hidden_dim=HIDDEN_DIM, output_dim=OUTPUT_DIM):
    """Pack per-trunk weights into lane-dense block-diagonal slabs.

    Big matmul weights (w2/w3/w4) are cast to bf16 (MXU-native on all gens);
    biases, the layer-1 row and the 0/1 constant matrices stay f32.
    """
    H, D = hidden_dim, output_dim
    dd = D * D
    assert 3 * H <= TRUNK_W and 2 * dd + D <= ABC_W and D <= OUT_W

    w1r = jnp.zeros((1, TRUNK_W), jnp.float32)
    b1p = jnp.zeros((1, TRUNK_W), jnp.float32)
    w2p = jnp.zeros((TRUNK_W, TRUNK_W), jnp.float32)
    b2p = jnp.zeros((1, TRUNK_W), jnp.float32)
    w3p = jnp.zeros((TRUNK_W, TRUNK_W), jnp.float32)
    b3p = jnp.zeros((1, TRUNK_W), jnp.float32)
    w4p = jnp.zeros((TRUNK_W, ABC_W), jnp.float32)
    b4p = jnp.zeros((1, ABC_W), jnp.float32)

    for i in range(3):  # trunk order: A, B, C
        lo, hi = i * H, (i + 1) * H
        w1r = w1r.at[0, lo:hi].set(params['w1'][i, 0])
        b1p = b1p.at[0, lo:hi].set(params['b1'][i, 0])
        w2p = w2p.at[lo:hi, lo:hi].set(params['w2'][i])
        b2p = b2p.at[0, lo:hi].set(params['b2'][i, 0])
        w3p = w3p.at[lo:hi, lo:hi].set(params['w3'][i])
        b3p = b3p.at[0, lo:hi].set(params['b3'][i, 0])

    w4p = w4p.at[0:H, 0:dd].set(params['wa4'])
    w4p = w4p.at[H:2 * H, dd:2 * dd].set(params['wb4'])
    w4p = w4p.at[2 * H:3 * H, 2 * dd:2 * dd + D].set(params['wc4'])
    b4p = b4p.at[0, 0:dd].set(params['ba4'][0])
    b4p = b4p.at[0, dd:2 * dd].set(params['bb4'][0])
    b4p = b4p.at[0, 2 * dd:2 * dd + D].set(params['bc4'][0])

    # Constant replication matrix: rep[j, i*D + j] = 1  (x -> x tiled D times).
    rep = (jnp.arange(dd)[None, :] % D == jnp.arange(D)[:, None]
           ).astype(jnp.float32)                                   # (D, D*D)
    # Constant block-sum matrix: summ[i*D + j, i] = 1 (cols >= D stay zero).
    summ = (jnp.arange(dd)[:, None] // D == jnp.arange(OUT_W)[None, :]
            ).astype(jnp.float32)                                  # (D*D, OUT_W)

    bf = jnp.bfloat16
    return (w1r, b1p, w2p.astype(bf), b2p, w3p.astype(bf), b3p,
            w4p.astype(bf), b4p, rep, summ)


def gaussian_net_forward(params, theta, x, t,
                         hidden_dim=HIDDEN_DIM, output_dim=OUTPUT_DIM,
                         max_tile=MAX_TILE):
    """Mirrors GaussianNet.forward: score = A_t(t) @ (theta + B_t(t) @ x + C_t(t))."""
    D = output_dim
    t = jnp.asarray(t, jnp.float32)
    theta = jnp.asarray(theta, jnp.float32)
    x = jnp.asarray(x, jnp.float32)

    if t.ndim == 0:
        t = t[None]
    cut = False
    if theta.ndim == 1:
        theta, x, cut = theta[None], x[None], True

    # Broadcast batch dims (torch relies on bmm broadcasting / `broadcast` helper).
    n = max(theta.shape[0], x.shape[0], t.shape[0])
    theta = jnp.broadcast_to(theta, (n, D))
    x = jnp.broadcast_to(x, (n, D))
    t_flat = jnp.broadcast_to(t.reshape(-1), (n,))

    # Tile size: at most max_tile rows, and at least 2 grid steps once n is
    # large enough so the "parallel" axis shards across both TCs on v7x.
    tn = min(max_tile, max(8, _round_up(-(-n // 2), 8)))
    n_pad = _round_up(n, tn)

    # One lane-dense input slab: [theta | x | t | pad].  (padded rows get
    # t=0/theta=0/x=0; their outputs are sliced away below.)
    slab_w = _round_up(2 * D + 1, 8)
    slab = jnp.zeros((n_pad, slab_w), jnp.float32)
    slab = slab.at[:n, 0:D].set(theta)
    slab = slab.at[:n, D:2 * D].set(x)
    slab = slab.at[:n, 2 * D].set(t_flat)

    packed = pack_params(params, hidden_dim, output_dim)

    const_map = lambda i: (0, 0)                      # weights resident in VMEM
    weight_specs = [pl.BlockSpec(w.shape, const_map) for w in packed]

    out_pad = pl.pallas_call(
        functools.partial(_gaussian_net_kernel, d=D),
        out_shape=jax.ShapeDtypeStruct((n_pad, OUT_W), jnp.float32),
        grid=(n_pad // tn,),
        in_specs=[pl.BlockSpec((tn, slab_w), lambda i: (i, 0))] + weight_specs,
        out_specs=pl.BlockSpec((tn, OUT_W), lambda i: (i, 0)),
        compiler_params=pltpu.CompilerParams(
            dimension_semantics=("parallel",),
            vmem_limit_bytes=48 * 1024 * 1024),
    )(slab, *packed)

    score = out_pad[:n, :D]
    return score[0] if cut else score


def reference_forward(params, theta, x, t, output_dim=OUTPUT_DIM):
    """Pure-JAX f32 reference of the same semantics (for verification)."""
    D = output_dim
    t2 = jnp.asarray(t, jnp.float32).reshape(-1, 1)

    def trunk(i):
        h = jnp.maximum(t2 @ params['w1'][i] + params['b1'][i], 0.0)
        h = jnp.maximum(h @ params['w2'][i] + params['b2'][i], 0.0)
        h = jnp.maximum(h @ params['w3'][i] + params['b3'][i], 0.0)
        return h

    A = (trunk(0) @ params['wa4'] + params['ba4']).reshape(-1, D, D)
    B = (trunk(1) @ params['wb4'] + params['bb4']).reshape(-1, D, D)
    C = trunk(2) @ params['wc4'] + params['bc4']
    v = theta + jnp.einsum('nij,nj->ni', B, x) + C
    return jnp.einsum('nij,nj->ni', A, v)


if __name__ == "__main__":
    key = jax.random.PRNGKey(0)
    k_par, k_theta, k_x, k_t = jax.random.split(key, 4)

    N, D, H = 8, OUTPUT_DIM, HIDDEN_DIM
    params = init_params(k_par, H, D)
    theta = jax.random.normal(k_theta, (N, D), jnp.float32)
    x = jax.random.normal(k_x, (N, D), jnp.float32)
    t = jax.random.uniform(k_t, (N,), jnp.float32)

    # Single-tile path.  (bf16 trunk matmuls -> loosened tolerance.)
    score = jax.block_until_ready(gaussian_net_forward(params, theta, x, t))
    ref = jax.block_until_ready(reference_forward(params, theta, x, t))
    assert score.shape == (N, D)
    assert jnp.allclose(score, ref, atol=5e-2, rtol=5e-2), "mismatch vs reference"

    # Multi-tile grid path (small tiles to exercise the batch grid + padding).
    N2 = 24
    theta2 = jax.random.normal(k_theta, (N2, D), jnp.float32)
    x2 = jax.random.normal(k_x, (N2, D), jnp.float32)
    t2 = jax.random.uniform(k_t, (N2,), jnp.float32)
    score2 = jax.block_until_ready(
        gaussian_net_forward(params, theta2, x2, t2, max_tile=8))
    ref2 = jax.block_until_ready(reference_forward(params, theta2, x2, t2))
    assert score2.shape == (N2, D)
    assert jnp.allclose(score2, ref2, atol=5e-2, rtol=5e-2), "mismatch (gridded)"

    print("KERNEL_OK")
</pallas_src>

<mosaic_0001>
module attributes {stable_mosaic.version = 11 : i64} {
  func.func @_gaussian_net_kernel(%arg0: i32, %arg1: memref<8x16xf32, #tpu.memory_space<vmem>>, %arg2: memref<1x128xf32, #tpu.memory_space<vmem>>, %arg3: memref<1x128xf32, #tpu.memory_space<vmem>>, %arg4: memref<128x128xbf16, #tpu.memory_space<vmem>>, %arg5: memref<1x128xf32, #tpu.memory_space<vmem>>, %arg6: memref<128x128xbf16, #tpu.memory_space<vmem>>, %arg7: memref<1x128xf32, #tpu.memory_space<vmem>>, %arg8: memref<128x128xbf16, #tpu.memory_space<vmem>>, %arg9: memref<1x128xf32, #tpu.memory_space<vmem>>, %arg10: memref<4x16xf32, #tpu.memory_space<vmem>>, %arg11: memref<16x8xf32, #tpu.memory_space<vmem>>, %arg12: memref<8x8xf32, #tpu.memory_space<vmem>>) attributes {dimension_semantics = [#tpu.dimension_semantics<parallel>], iteration_bounds = array<i64: 1>, scalar_prefetch = 0 : i64, scratch_operands = 0 : i64, tpu.core_type = #tpu.core_type<tc>, window_params = [{transform_indices = @transform_0, window_bounds = array<i64: 8, 16>}, {pipeline_mode = #tpu.pipeline_mode<synchronous>, transform_indices = @transform_1, window_bounds = array<i64: 1, 128>}, {pipeline_mode = #tpu.pipeline_mode<synchronous>, transform_indices = @transform_2, window_bounds = array<i64: 1, 128>}, {pipeline_mode = #tpu.pipeline_mode<synchronous>, transform_indices = @transform_3, window_bounds = array<i64: 128, 128>}, {pipeline_mode = #tpu.pipeline_mode<synchronous>, transform_indices = @transform_4, window_bounds = array<i64: 1, 128>}, {pipeline_mode = #tpu.pipeline_mode<synchronous>, transform_indices = @transform_5, window_bounds = array<i64: 128, 128>}, {pipeline_mode = #tpu.pipeline_mode<synchronous>, transform_indices = @transform_6, window_bounds = array<i64: 1, 128>}, {pipeline_mode = #tpu.pipeline_mode<synchronous>, transform_indices = @transform_7, window_bounds = array<i64: 128, 128>}, {pipeline_mode = #tpu.pipeline_mode<synchronous>, transform_indices = @transform_8, window_bounds = array<i64: 1, 128>}, {pipeline_mode = #tpu.pipeline_mode<synchronous>, transform_indices = @transform_9, window_bounds = array<i64: 4, 16>}, {pipeline_mode = #tpu.pipeline_mode<synchronous>, transform_indices = @transform_10, window_bounds = array<i64: 16, 8>}, {transform_indices = @transform_11, window_bounds = array<i64: 8, 8>}]} {
    %c0 = arith.constant 0 : index
    %c0_0 = arith.constant 0 : index
    %0 = vector.load %arg1[%c0, %c0_0] : memref<8x16xf32, #tpu.memory_space<vmem>>, vector<8x16xf32>
    %1 = vector.extract_strided_slice %0 {offsets = [0, 8], sizes = [8, 1], strides = [1, 1]} : vector<8x16xf32> to vector<8x1xf32>
    %c0_1 = arith.constant 0 : index
    %c0_2 = arith.constant 0 : index
    %2 = vector.load %arg2[%c0_1, %c0_2] : memref<1x128xf32, #tpu.memory_space<vmem>>, vector<1x128xf32>
    %3 = vector.broadcast %1 : vector<8x1xf32> to vector<8x128xf32>
    %4 = vector.broadcast %2 : vector<1x128xf32> to vector<8x128xf32>
    %5 = arith.mulf %3, %4 : vector<8x128xf32>
    %c0_3 = arith.constant 0 : index
    %c0_4 = arith.constant 0 : index
    %6 = vector.load %arg3[%c0_3, %c0_4] : memref<1x128xf32, #tpu.memory_space<vmem>>, vector<1x128xf32>
    %7 = vector.broadcast %6 : vector<1x128xf32> to vector<8x128xf32>
    %8 = arith.addf %5, %7 : vector<8x128xf32>
    %cst = arith.constant 0.000000e+00 : f32
    %9 = vector.broadcast %cst : f32 to vector<8x128xf32>
    %10 = arith.maximumf %8, %9 : vector<8x128xf32>
    %11 = arith.truncf %10 : vector<8x128xf32> to vector<8x128xbf16>
    %c0_5 = arith.constant 0 : index
    %c0_6 = arith.constant 0 : index
    %12 = vector.load %arg4[%c0_5, %c0_6] : memref<128x128xbf16, #tpu.memory_space<vmem>>, vector<128x128xbf16>
    %cst_7 = arith.constant dense<0.000000e+00> : vector<8x128xf32>
    %13 = tpu.matmul %11, %12, %cst_7 {dimension_numbers = #tpu.dot_dimension_numbers<[1], [0], [0], [1], [0, 0, 1, 1], [], []>} : vector<8x128xbf16>, vector<128x128xbf16>, vector<8x128xf32> -> vector<8x128xf32>
    %c0_8 = arith.constant 0 : index
    %c0_9 = arith.constant 0 : index
    %14 = vector.load %arg5[%c0_8, %c0_9] : memref<1x128xf32, #tpu.memory_space<vmem>>, vector<1x128xf32>
    %15 = vector.broadcast %14 : vector<1x128xf32> to vector<8x128xf32>
    %16 = arith.addf %13, %15 : vector<8x128xf32>
    %cst_10 = arith.constant 0.000000e+00 : f32
    %17 = vector.broadcast %cst_10 : f32 to vector<8x128xf32>
    %18 = arith.maximumf %16, %17 : vector<8x128xf32>
    %19 = arith.truncf %18 : vector<8x128xf32> to vector<8x128xbf16>
    %c0_11 = arith.constant 0 : index
    %c0_12 = arith.constant 0 : index
    %20 = vector.load %arg6[%c0_11, %c0_12] : memref<128x128xbf16, #tpu.memory_space<vmem>>, vector<128x128xbf16>
    %cst_13 = arith.constant dense<0.000000e+00> : vector<8x128xf32>
    %21 = tpu.matmul %19, %20, %cst_13 {dimension_numbers = #tpu.dot_dimension_numbers<[1], [0], [0], [1], [0, 0, 1, 1], [], []>} : vector<8x128xbf16>, vector<128x128xbf16>, vector<8x128xf32> -> vector<8x128xf32>
    %c0_14 = arith.constant 0 : index
    %c0_15 = arith.constant 0 : index
    %22 = vector.load %arg7[%c0_14, %c0_15] : memref<1x128xf32, #tpu.memory_space<vmem>>, vector<1x128xf32>
    %23 = vector.broadcast %22 : vector<1x128xf32> to vector<8x128xf32>
    %24 = arith.addf %21, %23 : vector<8x128xf32>
    %cst_16 = arith.constant 0.000000e+00 : f32
    %25 = vector.broadcast %cst_16 : f32 to vector<8x128xf32>
    %26 = arith.maximumf %24, %25 : vector<8x128xf32>
    %27 = arith.truncf %26 : vector<8x128xf32> to vector<8x128xbf16>
    %c0_17 = arith.constant 0 : index
    %c0_18 = arith.constant 0 : index
    %28 = vector.load %arg8[%c0_17, %c0_18] : memref<128x128xbf16, #tpu.memory_space<vmem>>, vector<128x128xbf16>
    %cst_19 = arith.constant dense<0.000000e+00> : vector<8x128xf32>
    %29 = tpu.matmul %27, %28, %cst_19 {dimension_numbers = #tpu.dot_dimension_numbers<[1], [0], [0], [1], [0, 0, 1, 1], [], []>} : vector<8x128xbf16>, vector<128x128xbf16>, vector<8x128xf32> -> vector<8x128xf32>
    %c0_20 = arith.constant 0 : index
    %c0_21 = arith.constant 0 : index
    %30 = vector.load %arg9[%c0_20, %c0_21] : memref<1x128xf32, #tpu.memory_space<vmem>>, vector<1x128xf32>
    %31 = vector.broadcast %30 : vector<1x128xf32> to vector<8x128xf32>
    %32 = arith.addf %29, %31 : vector<8x128xf32>
    %33 = vector.extract_strided_slice %32 {offsets = [0, 0], sizes = [8, 16], strides = [1, 1]} : vector<8x128xf32> to vector<8x16xf32>
    %34 = vector.extract_strided_slice %32 {offsets = [0, 16], sizes = [8, 16], strides = [1, 1]} : vector<8x128xf32> to vector<8x16xf32>
    %35 = vector.extract_strided_slice %32 {offsets = [0, 32], sizes = [8, 4], strides = [1, 1]} : vector<8x128xf32> to vector<8x4xf32>
    %36 = vector.extract_strided_slice %0 {offsets = [0, 0], sizes = [8, 4], strides = [1, 1]} : vector<8x16xf32> to vector<8x4xf32>
    %37 = vector.extract_strided_slice %0 {offsets = [0, 4], sizes = [8, 4], strides = [1, 1]} : vector<8x16xf32> to vector<8x4xf32>
    %c0_22 = arith.constant 0 : index
    %c0_23 = arith.constant 0 : index
    %38 = vector.load %arg10[%c0_22, %c0_23] : memref<4x16xf32, #tpu.memory_space<vmem>>, vector<4x16xf32>
    %c0_24 = arith.constant 0 : index
    %c0_25 = arith.constant 0 : index
    %39 = vector.load %arg11[%c0_24, %c0_25] : memref<16x8xf32, #tpu.memory_space<vmem>>, vector<16x8xf32>
    %cst_26 = arith.constant dense<0.000000e+00> : vector<8x16xf32>
    %40 = tpu.matmul %37, %38, %cst_26 {dimension_numbers = #tpu.dot_dimension_numbers<[1], [0], [0], [1], [0, 0, 1, 1], [], []>} : vector<8x4xf32>, vector<4x16xf32>, vector<8x16xf32> -> vector<8x16xf32>
    %41 = arith.mulf %34, %40 : vector<8x16xf32>
    %cst_27 = arith.constant dense<0.000000e+00> : vector<8x8xf32>
    %42 = tpu.matmul %41, %39, %cst_27 {dimension_numbers = #tpu.dot_dimension_numbers<[1], [0], [0], [1], [0, 0, 1, 1], [], []>} : vector<8x16xf32>, vector<16x8xf32>, vector<8x8xf32> -> vector<8x8xf32>
    %43 = vector.extract_strided_slice %42 {offsets = [0, 0], sizes = [8, 4], strides = [1, 1]} : vector<8x8xf32> to vector<8x4xf32>
    %44 = arith.addf %36, %43 : vector<8x4xf32>
    %45 = arith.addf %44, %35 : vector<8x4xf32>
    %cst_28 = arith.constant dense<0.000000e+00> : vector<8x16xf32>
    %46 = tpu.matmul %45, %38, %cst_28 {dimension_numbers = #tpu.dot_dimension_numbers<[1], [0], [0], [1], [0, 0, 1, 1], [], []>} : vector<8x4xf32>, vector<4x16xf32>, vector<8x16xf32> -> vector<8x16xf32>
    %47 = arith.mulf %33, %46 : vector<8x16xf32>
    %cst_29 = arith.constant dense<0.000000e+00> : vector<8x8xf32>
    %48 = tpu.matmul %47, %39, %cst_29 {dimension_numbers = #tpu.dot_dimension_numbers<[1], [0], [0], [1], [0, 0, 1, 1], [], []>} : vector<8x16xf32>, vector<16x8xf32>, vector<8x8xf32> -> vector<8x8xf32>
    %c0_30 = arith.constant 0 : index
    %c0_31 = arith.constant 0 : index
    %49 = vector.load %arg12[%c0_30, %c0_31] : memref<8x8xf32, #tpu.memory_space<vmem>>, vector<8x8xf32>
    tpu.vector_store %arg12[%c0_30, %c0_31], %48 {strides = array<i32>} : memref<8x8xf32, #tpu.memory_space<vmem>>, vector<8x8xf32>,
    return
  }
  func.func @transform_0(%arg0: i32) -> (i32, i32) {
    %c0_i32 = arith.constant 0 : i32
    %c0_i32_0 = arith.constant 0 : i32
    return %arg0, %c0_i32 : i32, i32
  }
  func.func @transform_1(%arg0: i32) -> (i32, i32) {
    %c0_i32 = arith.constant 0 : i32
    %c0_i32_0 = arith.constant 0 : i32
    %c0_i32_1 = arith.constant 0 : i32
    return %c0_i32, %c0_i32_0 : i32, i32
  }
  func.func @transform_2(%arg0: i32) -> (i32, i32) {
    %c0_i32 = arith.constant 0 : i32
    %c0_i32_0 = arith.constant 0 : i32
    %c0_i32_1 = arith.constant 0 : i32
    return %c0_i32, %c0_i32_0 : i32, i32
  }
  func.func @transform_3(%arg0: i32) -> (i32, i32) {
    %c0_i32 = arith.constant 0 : i32
    %c0_i32_0 = arith.constant 0 : i32
    %c0_i32_1 = arith.constant 0 : i32
    return %c0_i32, %c0_i32_0 : i32, i32
  }
  func.func @transform_4(%arg0: i32) -> (i32, i32) {
    %c0_i32 = arith.constant 0 : i32
    %c0_i32_0 = arith.constant 0 : i32
    %c0_i32_1 = arith.constant 0 : i32
    return %c0_i32, %c0_i32_0 : i32, i32
  }
  func.func @transform_5(%arg0: i32) -> (i32, i32) {
    %c0_i32 = arith.constant 0 : i32
    %c0_i32_0 = arith.constant 0 : i32
    %c0_i32_1 = arith.constant 0 : i32
    return %c0_i32, %c0_i32_0 : i32, i32
  }
  func.func @transform_6(%arg0: i32) -> (i32, i32) {
    %c0_i32 = arith.constant 0 : i32
    %c0_i32_0 = arith.constant 0 : i32
    %c0_i32_1 = arith.constant 0 : i32
    return %c0_i32, %c0_i32_0 : i32, i32
  }
  func.func @transform_7(%arg0: i32) -> (i32, i32) {
    %c0_i32 = arith.constant 0 : i32
    %c0_i32_0 = arith.constant 0 : i32
    %c0_i32_1 = arith.constant 0 : i32
    return %c0_i32, %c0_i32_0 : i32, i32
  }
  func.func @transform_8(%arg0: i32) -> (i32, i32) {
    %c0_i32 = arith.constant 0 : i32
    %c0_i32_0 = arith.constant 0 : i32
    %c0_i32_1 = arith.constant 0 : i32
    return %c0_i32, %c0_i32_0 : i32, i32
  }
  func.func @transform_9(%arg0: i32) -> (i32, i32) {
    %c0_i32 = arith.constant 0 : i32
    %c0_i32_0 = arith.constant 0 : i32
    %c0_i32_1 = arith.constant 0 : i32
    return %c0_i32, %c0_i32_0 : i32, i32
  }
  func.func @transform_10(%arg0: i32) -> (i32, i32) {
    %c0_i32 = arith.constant 0 : i32
    %c0_i32_0 = arith.constant 0 : i32
    %c0_i32_1 = arith.constant 0 : i32
    return %c0_i32, %c0_i32_0 : i32, i32
  }
  func.func @transform_11(%arg0: i32) -> (i32, i32) {
    %c0_i32 = arith.constant 0 : i32
    %c0_i32_0 = arith.constant 0 : i32
    return %arg0, %c0_i32 : i32, i32
  }
}

</mosaic_0001>

<bundles_post_ra>
// kernel: tpu_custom_call.1
= control target key start
LH: loop header
LB: loop body
LE: loop exit
PB: predicated region body
PF: predicated region fallthrough
CT: control target
= control target key end

     0   :  { %16 = vsyncpa [#allocation3], 0  ;;  %s1287_s0 = inlined_call_operand.vmem [shape: f32[8,16], index: 0, kind: input, shape index: {}]   ;;  %s1288_s1 = inlined_call_operand.vmem [shape: f32[1,128], index: 1, kind: input, shape index: {}]   ;;  %s1289_s2 = inlined_call_operand.vmem [shape: f32[1,128], index: 2, kind: input, shape index: {}]   ;;  %s1290_s3 = inlined_call_operand.hbm [shape: bf16[128,128], index: 3, kind: input, shape index: {}]   ;;  %s1291_s4 = inlined_call_operand.vmem [shape: f32[1,128], index: 4, kind: input, shape index: {}]   ;;  %s1292_s5 = inlined_call_operand.hbm [shape: bf16[128,128], index: 5, kind: input, shape index: {}]   ;;  %s1293_s6 = inlined_call_operand.vmem [shape: f32[1,128], index: 6, kind: input, shape index: {}]   ;;  %s1294_s7 = inlined_call_operand.hbm [shape: bf16[128,128], index: 7, kind: input, shape index: {}]   ;;  %s1295_s8 = inlined_call_operand.vmem [shape: f32[1,128], index: 8, kind: input, shape index: {}]   ;;  %s1296_s9 = inlined_call_operand.vmem [shape: f32[4,16], index: 9, kind: input, shape index: {}]   ;;  %s1297_s10 = inlined_call_operand.vmem [shape: f32[16,8], index: 10, kind: input, shape index: {}]   ;;  %s1298_s11 = inlined_call_operand.hbm [shape: f32[8,8], index: 11, kind: output, shape index: {}]  }
   0x1   :  { %17 = vsyncpa [#allocation6], 0 }
   0x2   :  { %18 = vsyncpa [#allocation4], 0  ;;  %s1071_s17 = smov [#allocation5]   ;;  %s1072_s19 = smov [#allocation2]  }
   0x3   :  { %s44_s18 = sshll.u32 %s1071_s17, 4  ;;  %s30_s20 = sshll.u32 %s1072_s19, 4  ;;  %s45_s18 = int_to_ptr.vmem [resolvable:$true] %s44_s18  ;;  %s1145_s20 = int_to_ptr.vmem [resolvable:$true] %s30_s20 }
   0x4   :  { %s977_s23 = scalar_lea.hbm %s1292_s5, 1024 }
   0x5   :  { %p978_p0 = scmp.ne.s32.totalorder %s1292_s5, %s977_s23  ;;  %p981_p1 = scmp.lt.u32.totalorder %s977_s23, %s1292_s5 }
   0x7   :  { %p983_p2 = pnand %p981_p1, %p978_p0 }
   0x9   :  { %986 = shalt.err (!%p983_p2)
}
   0xa   :  { %s987_s28 = scalar_lea.vmem %s45_s18, 1024  ;;  %p992_p4 = scmp.lt.s32.totalorder %s45_s18, %s45_s18 }
   0xb   :  { %p988_p3 = scmp.ne.s32.totalorder %s45_s18, %s987_s28  ;;  %p993_p5 = scmp.lt.s32.totalorder %s987_s28, %s987_s28 }
   0xd   :  { %p994_p6 = por %p993_p5, %p992_p4 }
   0xf   :  { %p995_p7 = pnand %p994_p6, %p988_p3 }
  0x11   :  { %998 = shalt.err (!%p995_p7)
}
  0x12   :  { %s1073_s29 = smov 64   ;;  %s1074_s30 = smov 4  }
  0x13   :  { %50 = dma.hbm_to_vmem [thread:$0]  %s1292_s5, 1024, %s45_s18, [#allocation6], %s1073_s29, %s1073_s29, %s1074_s30  }
  0x14   :  { %s999_s16 = scalar_lea.hbm %s1290_s3, 1024 }
  0x15   :  { %p1000_p8 = scmp.ne.s32.totalorder %s1290_s3, %s999_s16  ;;  %p1003_p9 = scmp.lt.u32.totalorder %s999_s16, %s1290_s3 }
  0x17   :  { %p1005_p10 = pnand %p1003_p9, %p1000_p8 }
  0x19   :  { %1008 = shalt.err (!%p1005_p10)
}
  0x1a   :  { %s1009_s23 = scalar_lea.vmem %s1145_s20, 1024  ;;  %p1014_p12 = scmp.lt.s32.totalorder %s1145_s20, %s1145_s20 }
  0x1b   :  { %p1010_p11 = scmp.ne.s32.totalorder %s1145_s20, %s1009_s23  ;;  %p1015_p13 = scmp.lt.s32.totalorder %s1009_s23, %s1009_s23 }
  0x1d   :  { %p1016_p0 = por %p1015_p13, %p1014_p12 }
  0x1f   :  { %p1017_p1 = pnand %p1016_p0, %p1010_p11 }
  0x21   :  { %1020 = shalt.err (!%p1017_p1)
}
  0x22   :  { %36 = dma.hbm_to_vmem [thread:$0]  %s1290_s3, 1024, %s1145_s20, [#allocation3], %s1073_s29, %s1073_s29, %s1074_s30  }
  0x23   :  { %s1075_s24 = smov [#allocation7]   ;;  %s1021_s28 = scalar_lea.hbm %s1294_s7, 1024 }
  0x24   :  { %s58_s25 = sshll.u32 %s1075_s24, 4  ;;  %p1022_p2 = scmp.ne.s32.totalorder %s1294_s7, %s1021_s28  ;;  %s59_s25 = int_to_ptr.vmem [resolvable:$true] %s58_s25 }
  0x25   :  { %p1025_p3 = scmp.lt.u32.totalorder %s1021_s28, %s1294_s7 }
  0x27   :  { %p1027_p4 = pnand %p1025_p3, %p1022_p2 }
  0x29   :  { %1030 = shalt.err (!%p1027_p4)
}
  0x2a   :  { %s1031_s16 = scalar_lea.vmem %s59_s25, 1024  ;;  %p1036_p6 = scmp.lt.s32.totalorder %s59_s25, %s59_s25 }
  0x2b   :  { %p1032_p5 = scmp.ne.s32.totalorder %s59_s25, %s1031_s16  ;;  %p1037_p7 = scmp.lt.s32.totalorder %s1031_s16, %s1031_s16 }
  0x2d   :  { %p1038_p8 = por %p1037_p7, %p1036_p6 }
  0x2f   :  { %p1039_p9 = pnand %p1038_p8, %p1032_p5 }
  0x31   :  { %1042 = shalt.err (!%p1039_p9)
}
  0x32   :  { %64 = dma.hbm_to_vmem [thread:$0]  %s1294_s7, 1024, %s59_s25, [#allocation6], %s1073_s29, %s1073_s29, %s1074_s30  }
  0x33   :  { %1065 = dma.done.wait [#allocation3], 1024  }
  0x34   :  { %1066 = vsyncadd [#allocation3], 4294966272 }
  0x35   :  { %1067 = dma.done.wait [#allocation6], 2048  }
  0x36   :  { %1068 = vsyncadd [#allocation6], 4294965248  ;;  %v1076_v0 = vmov 8   ;;  %v1077_v1 = vmov 0.0   ;;  %v1202_v2 = vld [vmem:[%s1287_s0] sm:$0xff]  ;;  %v954_v4 = vld [vmem:[#allocation2 + $0x8] sm:$0xff]  }
  0x37   :  { %952 = vset.pattern.permute.xlu0 %v1076_v0  ;;  %848 = vmatprep.subr.bf16.mxu0 %v1077_v1  ;;  %v953_v3 = vld [vmem:[#allocation2] sm:$0xff]   ;;  %v955_v5 = vld [vmem:[#allocation2 + $0x10] sm:$0xff]   ;;  %vm1078_vm0 = vmmov 0   ;;  %v956_v7 = vld [vmem:[#allocation2 + $0x18] sm:$0xff]   ;;  %s1079_s0 = smov 124   ;;  %vm450_vm1 = vcmask 1043456  }
  0x38   :  { %868 = vmatprep.subr.bf16.mxu1 %v1077_v1  ;;  %85 = vperm.xlu0 %952, %v1202_v2   ;;  %v961_v6 = vld [vmem:[#allocation5] sm:$0xff]   ;;  %v962_v8 = vld [vmem:[#allocation5 + $0x8] sm:$0xff]   ;;  %v963_v10 = vld [vmem:[#allocation5 + $0x10] sm:$0xff]   ;;  %vm447_vm2 = vcmask 31744   ;;  %s1080_s5 = smov 16   ;;  %v1081_v56 = vmov 0.0|0.0  }
  0x39   :  { %849 = vmatpush3.bf16.msra.mxu0 %v953_v3  ;;  %864 = vmatprep.mubr.msk.bf16.mxu0 %vm1078_vm0, %v1077_v1  ;;  %v957_v9 = vld [vmem:[#allocation2 + $0x20] sm:$0xff]   ;;  %v958_v11 = vld [vmem:[#allocation2 + $0x28] sm:$0xff]   ;;  %v964_v12 = vld [vmem:[#allocation5 + $0x18] sm:$0xff]   ;;  %s1082_s28 = smov 96   ;;  %vm532_vm3 = vcmask 130048   ;;  %vm758_vm4 = vcmask 64512  }
  0x3a   :  { %850 = vmatprep.subr.bf16.mxu0 %v1077_v1  ;;  %884 = vmatprep.mubr.msk.bf16.mxu1 %vm1078_vm0, %v1077_v1  ;;  %v959_v13 = vld [vmem:[#allocation2 + $0x30] sm:$0xff]   ;;  %v965_v14 = vld [vmem:[#allocation5 + $0x20] sm:$0xff]   ;;  %v960_v15 = vld [vmem:[#allocation2 + $0x38] sm:$0xff]  }
  0x3b   :  { %869 = vmatpush3.bf16.msra.mxu1 %v961_v6  ;;  %v966_v16 = vld [vmem:[#allocation5 + $0x28] sm:$0xff]   ;;  %v776_v17 = vld [vmem:[%s1288_s1] ss:$0 sm:$0xff]  ;;  %v967_v24 = vld [vmem:[#allocation5 + $0x30] sm:$0xff]  }
  0x3c   :  { %445 = vrot.lane.b32.xlu0 %v1202_v2, %s1079_s0  ;;  %870 = vmatprep.subr.bf16.mxu1 %v1077_v1  ;;  %v777_v18 = vld [vmem:[%s1289_s2] ss:$0 sm:$0xff]  ;;  %v968_v25 = vld [vmem:[#allocation5 + $0x38] sm:$0xff]   ;;  %v970_v27 = vld [vmem:[#allocation7 + $0x8] sm:$0xff]  }
  0x3d   :  { %851 = vmatpush3.bf16.msra.mxu0 %v954_v4  ;;  %v969_v26 = vld [vmem:[#allocation7] sm:$0xff]   ;;  %v971_v28 = vld [vmem:[#allocation7 + $0x10] sm:$0xff]   ;;  %v972_v29 = vld [vmem:[#allocation7 + $0x18] sm:$0xff]  }
  0x3e   :  { %852 = vmatprep.subr.bf16.mxu0 %v1077_v1  ;;  %v973_v30 = vld [vmem:[#allocation7 + $0x20] sm:$0xff]   ;;  %v974_v31 = vld [vmem:[#allocation7 + $0x28] sm:$0xff]   ;;  %v975_v42 = vld [vmem:[#allocation7 + $0x30] sm:$0xff]  }
  0x3f   :  { %871 = vmatpush3.bf16.msra.mxu1 %v962_v8  ;;  %v778_v32 = vld [vmem:[%s1291_s4] ss:$0 sm:$0xff]  ;;  %v976_v43 = vld [vmem:[#allocation7 + $0x38] sm:$0xff]   ;;  %v444_v55 = vld [vmem:[%s1297_s10 + $0x8] sm:$0xff] }
  0x40   :  { %872 = vmatprep.subr.bf16.mxu1 %v1077_v1  ;;  %v442_v40 = vld [vmem:[%s1296_s9] sm:$0xf] }
  0x41   :  { %853 = vmatpush3.bf16.msra.mxu0 %v955_v5  ;;  %v787_v44 = vld [vmem:[%s1293_s6] ss:$0 sm:$0xff] }
  0x42   :  { %854 = vmatprep.subr.bf16.mxu0 %v1077_v1  ;;  %v443_v54 = vld [vmem:[%s1297_s10] sm:$0xff]  ;;  %s1083_s10 = smov 112  }
  0x43   :  { %873 = vmatpush3.bf16.msra.mxu1 %v963_v10  ;;  %v933_v57 = vpack.c.bf16 %v444_v55, %v443_v54  ;;  %v796_v58 = vld [vmem:[%s1295_s8] ss:$0 sm:$0xff]  ;;  %s1084_s8 = smov [#allocation8]  }
  0x44   :  { %874 = vmatprep.subr.bf16.mxu1 %v1077_v1  ;;  %s766_s12 = sshll.u32 %s1084_s8, 4  ;;  %s767_s12 = int_to_ptr.vmem [resolvable:$true] %s766_s12 }
  0x45   :  { %855 = vmatpush3.bf16.msra.mxu0 %v956_v7  ;;  %s1043_s13 = scalar_lea.vmem %s767_s12, 128  ;;  %p1048_p11 = scmp.lt.s32.totalorder %s767_s12, %s767_s12 }
  0x46   :  { %856 = vmatprep.subr.bf16.mxu0 %v1077_v1  ;;  %p1044_p10 = scmp.ne.s32.totalorder %s767_s12, %s1043_s13  ;;  %p1049_p12 = scmp.lt.s32.totalorder %s1043_s13, %s1043_s13 }
  0x47   :  { %875 = vmatpush3.bf16.msra.mxu1 %v964_v12 }
  0x48   :  { %876 = vmatprep.subr.bf16.mxu1 %v1077_v1  ;;  %p1050_p13 = por %p1049_p12, %p1048_p11 }
  0x49   :  { %857 = vmatpush3.bf16.msra.mxu0 %v957_v9 }
  0x4a   :  { %858 = vmatprep.subr.bf16.mxu0 %v1077_v1  ;;  %p1051_p0 = pnand %p1050_p13, %p1044_p10 }
  0x4b   :  { %877 = vmatpush3.bf16.msra.mxu1 %v965_v14 }
  0x4c   :  { %878 = vmatprep.subr.bf16.mxu1 %v1077_v1 }
  0x4d   :  { %859 = vmatpush3.bf16.msra.mxu0 %v958_v11 }
  0x4e   :  { %860 = vmatprep.subr.bf16.mxu0 %v1077_v1 }
  0x4f   :  { %879 = vmatpush3.bf16.msra.mxu1 %v966_v16 }
  0x50   :  { %880 = vmatprep.subr.bf16.mxu1 %v1077_v1 }
  0x51   :  { %861 = vmatpush3.bf16.msra.mxu0 %v959_v13 }
  0x52   :  { %862 = vmatprep.subr.bf16.mxu0 %v1077_v1 }
  0x53   :  { %881 = vmatpush3.bf16.msra.mxu1 %v967_v24 }
  0x54   :  { %882 = vmatprep.subr.bf16.mxu1 %v1077_v1 }
  0x55   :  { %863 = vmatpush3.bf16.msra.mxu0 %v960_v15 }
  0x56   :  { %888 = vmatprep.subr.bf16.mxu0 %v1077_v1 }
  0x57   :  { %883 = vmatpush3.bf16.msra.mxu1 %v968_v25 }
  0x58   :  { %908 = vmatprep.subr.mxu1 %v1077_v1 }
  0xb7   :  { %v86_v19 = vpop.permute.xlu0 %85 }
  0xb8   :  { %v94_v20 = vmul.f32 %v776_v17, %v86_v19 }
  0xba   :  { %v102_v21 = vadd.f32 %v777_v18, %v94_v20 }
  0xbb   :  { %v446_v41 = vpop.permute.xlu0 %445 }
  0xbc   :  { %v103_v22 = vmax.f32 %v102_v21, 0.0 }
  0xbe   :  { %v104_v23 = vpack.c.bf16 %v103_v22, %v103_v22 }
  0xc0   :  { %865 = vmatmul.mubr.bf16.vlgmr.msra.gmra.mrb[0].mxu0 %v104_v23 }
  0xc1   :  { %904 = vmatprep.mubr.msk.bf16.mxu0 %vm1078_vm0, %v1077_v1  ;;  %889 = vmatpush3.bf16.msra.mxu0 %v969_v26 }
  0xc2   :  { %890 = vmatprep.subr.bf16.mxu0 %v1077_v1 }
  0xc5   :  { %891 = vmatpush3.bf16.msra.mxu0 %v970_v27 }
  0xc6   :  { %892 = vmatprep.subr.bf16.mxu0 %v1077_v1 }
  0xc9   :  { %893 = vmatpush3.bf16.msra.mxu0 %v971_v28 }
  0xca   :  { %894 = vmatprep.subr.bf16.mxu0 %v1077_v1 }
  0xcd   :  { %895 = vmatpush3.bf16.msra.mxu0 %v972_v29 }
  0xce   :  { %896 = vmatprep.subr.bf16.mxu0 %v1077_v1 }
  0xd1   :  { %897 = vmatpush3.bf16.msra.mxu0 %v973_v30 }
  0xd2   :  { %898 = vmatprep.subr.bf16.mxu0 %v1077_v1 }
  0xd5   :  { %899 = vmatpush3.bf16.msra.mxu0 %v974_v31 }
  0xd6   :  { %900 = vmatprep.subr.bf16.mxu0 %v1077_v1 }
  0xd9   :  { %901 = vmatpush3.bf16.msra.mxu0 %v975_v42 }
  0xda   :  { %902 = vmatprep.subr.bf16.mxu0 %v1077_v1 }
  0xdd   :  { %903 = vmatpush3.bf16.msra.mxu0 %v976_v43 }
 0x193   :  { %v210_v33 = vpop.f32.mrb[0].mxu0 }
 0x194   :  { %v211_v34 = vadd.f32 %v778_v32, %v210_v33  ;;  %v866_v35 = vpop.f32.mrb[1].mxu0 }
 0x195   :  { %v213_v36 = vpop.f32.mrb[2].mxu0 }
 0x196   :  { %v216_v37 = vmax.f32 %v211_v34, 0.0  ;;  %v867_v38 = vpop.f32.mrb[3].mxu0 }
 0x198   :  { %v217_v39 = vpack.c.bf16 %v216_v37, %v216_v37 }
 0x19a   :  { %885 = vmatmul.mubr.bf16.vlgmr.msra.gmra.mrb[0].mxu1 %v217_v39 }
 0x19b   :  { %909 = vmatpush3.msk.msra.mxu1 %vm450_vm1, %v442_v40  ;;  %910 = vmatprep.mubr.msk.f32.mxu1 %vm1078_vm0, %v1077_v1 }
 0x19c   :  { %932 = vmatprep.subr.bf16.mxu1 %v1081_v56 }
 0x1a2   :  { %911 = vmatmul.mubr.msk.f32.vlgmr.msra.gmra.mrb[4].mxu1 %vm447_vm2, %v446_v41 }
 0x1a3   :  { %917 = vmatprep.mubr.msk.f32.mxu1 %vm1078_vm0, %v1077_v1  ;;  %934 = vmatpush3.bf16.msra.mxu1 %v933_v57 }
 0x1a4   :  { %920 = vmatprep.subr.mxu1 %v1077_v1 }
 0x26d   :  { %v323_v45 = vpop.f32.mrb[0].mxu1 }
 0x26e   :  { %v324_v46 = vadd.f32 %v787_v44, %v323_v45  ;;  %v886_v47 = vpop.f32.mrb[1].mxu1 }
 0x26f   :  { %v326_v48 = vpop.f32.mrb[2].mxu1 }
 0x270   :  { %v329_v49 = vmax.f32 %v324_v46, 0.0  ;;  %v887_v50 = vpop.f32.mrb[3].mxu1 }
 0x272   :  { %v330_v51 = vpack.c.bf16 %v329_v49, %v329_v49 }
 0x274   :  { %905 = vmatmul.mubr.bf16.vlgmr.msra.gmra.mrb[4].mxu0 %v330_v51 }
 0x275   :  { %v520_v52 = vpop.f32.mrb[4].mxu1 }
 0x276   :  { %v912_v53 = vpop.f32.mrb[5].mxu1  ;;  %525 = vrot.lane.b32.xlu1 %v520_v52, %s1080_s5 }
 0x2e8   :  { %v526_v60 = vpop.permute.xlu1 %525 }
 0x347   :  { %v436_v59 = vpop.f32.mrb[4].mxu0 }
 0x348   :  { %v437_v61 = vadd.f32 %v796_v58, %v436_v59  ;;  %v906_v62 = vpop.f32.mrb[5].mxu0 }
 0x349   :  { %v439_v63 = vpop.f32.mrb[6].mxu0 }
 0x34a   :  { %v528_v0 = vmul.f32 %v526_v60, %v437_v61  ;;  %607 = vrot.lane.b32.xlu0 %v437_v61, %s1082_s28  ;;  %v907_v3 = vpop.f32.mrb[7].mxu0 }
 0x34c   :  { %530 = vrot.lane.b32.xlu1 %v528_v0, %s1083_s10 }
 0x3bc   :  { %v608_v8 = vpop.permute.xlu0 %607 }
 0x3be   :  { %v531_v4 = vpop.permute.xlu1 %530 }
 0x3bf   :  { %918 = vmatmul.mubr.msk.f32.vlgmr.msra.gmra.mrb[6].mxu1 %vm532_vm3, %v531_v4 }
 0x3c0   :  { %921 = vmatpush3.msk.msra.mxu1 %vm450_vm1, %v442_v40  ;;  %922 = vmatprep.mubr.msk.f32.mxu1 %vm1078_vm0, %v1077_v1 }
 0x3c1   :  { %935 = vmatprep.subr.bf16.mxu1 %v1081_v56 }
 0x492   :  { %v601_v5 = vpop.f32.mrb[6].mxu1 }
 0x493   :  { %v605_v6 = vadd.f32 %v601_v5, %v1202_v2  ;;  %v919_v7 = vpop.f32.mrb[7].mxu1 }
 0x495   :  { %v610_v9 = vadd.f32 %v608_v8, %v605_v6 }
 0x497   :  { %923 = vmatmul.mubr.msk.f32.vlgmr.msra.gmra.mrb[8].mxu1 %vm447_vm2, %v610_v9 }
 0x498   :  { %937 = vmatpush3.bf16.msra.mxu1 %v933_v57  ;;  %929 = vmatprep.mubr.msk.f32.mxu1 %vm1078_vm0, %v1077_v1 }
 0x56a   :  { %v680_v10 = vpop.f32.mrb[8].mxu1 }
 0x56b   :  { %v684_v11 = vmul.f32 %v680_v10, %v437_v61  ;;  %v924_v12 = vpop.f32.mrb[9].mxu1 }
 0x56d   :  { %930 = vmatmul.mubr.msk.f32.vlgmr.msra.gmra.mrb[10].mxu1 %vm532_vm3, %v684_v11 }
 0x640   :  { %v754_v13 = vpop.f32.mrb[10].mxu1 }
 0x641   :  { %v931_v2 = vpop.f32.mrb[11].mxu1  ;;  %759 = vst.msk [vmem:[#allocation8] sm:$0xff] %vm758_vm4, %v754_v13 }
 0x642   :  { %1054 = shalt.err (!%p1051_p0)
}
 0x643   :  { %s1055_s16 = scalar_lea.hbm %s1298_s11, 128 }
 0x644   :  { %p1056_p1 = scmp.ne.s32.totalorder %s1298_s11, %s1055_s16  ;;  %p1059_p2 = scmp.lt.u32.totalorder %s1055_s16, %s1298_s11 }
 0x646   :  { %p1061_p3 = pnand %p1059_p2, %p1056_p1 }
 0x648   :  { %1064 = shalt.err (!%p1061_p3)
}
 0x649   :  { %769 = dma.vmem_to_hbm [thread:$0]  %s767_s12, 128, %s1298_s11, [#allocation4]  }
 0x64a   :  { %1069 = dma.done.wait [#allocation4], 128  }
 0x64b   :  { %1070 = vsyncadd [#allocation4], 4294967168 }
 0x64c   :  { %773 = vsyncpa [#allocation3], 1 }
 0x64d   :  { %774 = vsyncpa [#allocation6], 1 }
 0x64e   :  { %775 = vsyncpa [#allocation4], 1 }

</bundles_post_ra>
